<compile_context>
chip_gen: v5e
topology: v5e:2x2
jax: 0.10.0
libtpu: 0.0.40
codegen_flags: <defaults>
</compile_context>

<pallas_src>
import functools

import jax
import jax.numpy as jnp
import numpy as np
from jax.experimental import pallas as pl
from jax.experimental.pallas import tpu as pltpu


def mixpool_kernel(e_ref, w_ref, b_ref, scal_ref, o_ref, max_sc, sum_sc,
                   *, num_heads, n_valid, needs_mask):
    # e_ref:   (Bt, Nt, D)   input tile (original dtype, typically f32)
    # w_ref:   (D, H*D)      weight (already transposed, bf16)
    # b_ref:   (1, H*D)      bias (f32)
    # scal_ref: SMEM (2,)    [p, (1-p)/N]
    # o_ref:   (Bt, 1, H*D)  output tile
    # max_sc:  (Bt, H*D) f32 running max of y over N
    # sum_sc:  (Bt, D)   f32 running sum of edata over N
    n_idx = pl.program_id(1)
    Bt, Nt, D = e_ref.shape
    HD = w_ref.shape[1]

    @pl.when(n_idx == 0)
    def _():
        max_sc[...] = jnp.full(max_sc.shape, -jnp.inf, dtype=max_sc.dtype)
        sum_sc[...] = jnp.zeros(sum_sc.shape, dtype=sum_sc.dtype)

    x = e_ref[...]                                            # (Bt, Nt, D)

    # Layout-free collapse: Nt is always a multiple of 8 (f32 sublane count).
    x2 = x.reshape(Bt * Nt, D)
    # bf16 MXU operands, f32 accumulation.
    y = jnp.dot(x2.astype(jnp.bfloat16), w_ref[...],
                preferred_element_type=jnp.float32)           # (Bt*Nt, H*D)
    y = y.reshape(Bt, Nt, HD)

    if needs_mask:
        # Padded N rows must not win the max (zeros would beat all-negative columns).
        rows = n_idx * Nt + jax.lax.broadcasted_iota(jnp.int32, (Bt, Nt, 1), 1)
        y = jnp.where(rows < n_valid, y, -jnp.inf)

    max_sc[...] = jnp.maximum(max_sc[...], jnp.max(y, axis=1))
    # Zero-padded rows contribute nothing to the sum; 1/true_N is folded into q.
    sum_sc[...] = sum_sc[...] + jnp.sum(x.astype(jnp.float32), axis=1)

    @pl.when(n_idx == pl.num_programs(1) - 1)
    def _():
        p = scal_ref[0]
        q = scal_ref[1]                                       # (1 - p) / N
        mx = max_sc[...] + b_ref[...]                         # bias after max (equal)
        s = q * sum_sc[...]                                   # (Bt, D) mean term
        # Per-head static lane slices instead of jnp.tile(s, (1, H)).
        for h in range(num_heads):
            o_ref[:, 0, h * D:(h + 1) * D] = (
                p * mx[:, h * D:(h + 1) * D] + s).astype(o_ref.dtype)


def _vmem_estimate(bt, nt, d, hd):
    """Rough per-step VMEM bytes for the chosen tiling."""
    in_tile = 2 * bt * nt * d * 4          # double-buffered f32 input tile
    xb = bt * nt * d * 2                   # bf16 cast copy of the tile
    y_tile = bt * nt * hd * 4              # f32 matmul result
    w = d * hd * 2                         # bf16 weight, single-buffered
    b = hd * 4                             # bias
    out = 2 * bt * hd * 4                  # double-buffered output tile
    scr = bt * hd * 4 + bt * d * 4         # max/sum scratch
    return in_tile + xb + y_tile + w + b + out + scr


def _choose_blocks(B, N, D, HD, block_b=None, block_n=None, *,
                   target_rows=512, vmem_budget_bytes=20 << 20):
    """Pick (Bt, Nt): Bt*Nt ~ target matmul rows, within the VMEM budget, with an
    even (>=2) number of batch blocks when B > 1 (balanced v7x megacore work)."""
    n8 = ((N + 7) // 8) * 8                # f32 sublane alignment of the N tile
    Nt = block_n if block_n is not None else min(n8, 512)
    Nt = max(8, ((Nt + 7) // 8) * 8)

    if block_b is not None:
        Bt = block_b
    else:
        Bt = max(1, min(B, -(-target_rows // Nt)))

    while Bt > 1 and _vmem_estimate(Bt, Nt, D, HD) > vmem_budget_bytes:
        Bt -= 1
    while Nt > 8 and _vmem_estimate(Bt, Nt, D, HD) > vmem_budget_bytes:
        Nt = max(8, Nt - 8)

    if B > 1 and block_b is None:
        nb = -(-B // Bt)
        if nb < 2:
            Bt = -(-B // 2)
            nb = -(-B // Bt)
        while Bt > 1 and nb % 2 == 1:      # even block count for 2-TC chips
            Bt -= 1
            nb = -(-B // Bt)
    return Bt, Nt


def mixpool2d(edata, weight_t, bias, p, *, num_heads, block_b=None, block_n=None):
    """MixPool2d forward.

    edata:    (B, N, D)
    weight_t: (D, H*D)  -- torch Linear weight ALREADY transposed (W.T); cast to bf16
                           here (cache per layer in practice).
    bias:     (H*D,)
    p:        scalar mixing parameter.
    Returns (1, B, H*D).
    """
    B, N, D = edata.shape
    HD = num_heads * D
    assert weight_t.shape == (D, HD)

    Bt, Nt = _choose_blocks(B, N, D, HD, block_b, block_n)
    n_blocks_b = pl.cdiv(B, Bt)
    n_blocks_n = pl.cdiv(N, Nt)
    B_pad = n_blocks_b * Bt
    N_pad = n_blocks_n * Nt
    if B_pad != B or N_pad != N:
        # Zero padding: padded batch rows only produce sliced-off output rows;
        # padded N rows are masked to -inf in-kernel before the max.
        edata = jnp.pad(edata, ((0, B_pad - B), (0, N_pad - N), (0, 0)))

    w_bf16 = weight_t.astype(jnp.bfloat16)
    bias2 = bias.astype(jnp.float32).reshape(1, HD)
    p_f = jnp.asarray(p, jnp.float32)
    scal = jnp.stack([p_f, (1.0 - p_f) / jnp.float32(N)])      # [p, (1-p)/N]

    kernel = functools.partial(mixpool_kernel, num_heads=num_heads,
                               n_valid=N, needs_mask=(N_pad != N))

    # Only raise the scoped VMEM limit when the tiling actually needs it.
    est = _vmem_estimate(Bt, Nt, D, HD)
    cp_kwargs = dict(dimension_semantics=("parallel", "arbitrary"))
    if est > (12 << 20):
        cp_kwargs["vmem_limit_bytes"] = min(int(est * 2) + (4 << 20), 48 << 20)

    out = pl.pallas_call(
        kernel,
        out_shape=jax.ShapeDtypeStruct((B_pad, 1, HD), edata.dtype),
        grid=(n_blocks_b, n_blocks_n),
        in_specs=[
            pl.BlockSpec((Bt, Nt, D), lambda b, n: (b, n, 0)),
            pl.BlockSpec((D, HD), lambda b, n: (0, 0),
                         pipeline_mode=pl.Buffered(1)),          # resident weight
            pl.BlockSpec((1, HD), lambda b, n: (0, 0),
                         pipeline_mode=pl.Buffered(1)),          # resident bias
            pl.BlockSpec(memory_space=pltpu.MemorySpace.SMEM),   # [p, (1-p)/N]
        ],
        out_specs=pl.BlockSpec((Bt, 1, HD), lambda b, n: (b, 0, 0)),
        scratch_shapes=[pltpu.VMEM((Bt, HD), jnp.float32),       # running max
                        pltpu.VMEM((Bt, D), jnp.float32)],       # running sum
        compiler_params=pltpu.CompilerParams(**cp_kwargs),
    )(edata, w_bf16, bias2, scal)

    if B_pad != B:
        out = out[:B]
    # (B, 1, H*D) -> (1, B, H*D): pure metadata reshape (no transpose pass).
    return out.reshape(1, B, HD)


def mixpool2d_ref(edata, weight, bias, p, *, num_heads):
    """Pure-JAX reference mirroring the PyTorch forward (weight in torch layout)."""
    y = jnp.einsum("bnd,kd->bnk", edata, weight) + bias            # Linear
    max_pool = jnp.max(y, axis=1)[None]                            # (1, B, H*D)
    avg = jnp.mean(edata, axis=1)                                  # (B, D)
    avg_pool = jnp.concatenate([avg] * num_heads, axis=1)[None]    # (1, B, H*D)
    return p * max_pool + (1.0 - p) * avg_pool


if __name__ == "__main__":
    out_dim = 32
    num_heads = 4
    B, N = 2, 8

    key = jax.random.PRNGKey(0)
    k_e, k_w, k_b = jax.random.split(key, 3)

    edata = jax.random.normal(k_e, (B, N, out_dim), dtype=jnp.float32)
    # Deterministic "Linear(out_dim, num_heads*out_dim)" params (torch-like uniform init).
    bound = 1.0 / np.sqrt(out_dim)
    weight = jax.random.uniform(k_w, (num_heads * out_dim, out_dim),
                                minval=-bound, maxval=bound, dtype=jnp.float32)
    bias = jax.random.uniform(k_b, (num_heads * out_dim,),
                              minval=-bound, maxval=bound, dtype=jnp.float32)
    p = jnp.float32(0.5)

    # Hoisted once (cached per layer in practice): no per-call HBM transpose.
    weight_t = jnp.transpose(weight)                               # (D, H*D)

    out = mixpool2d(edata, weight_t, bias, p, num_heads=num_heads)
    out = jax.block_until_ready(out)

    ref = mixpool2d_ref(edata, weight, bias, p, num_heads=num_heads)
    # bf16 MXU operands -> loosened tolerance vs the f32 reference.
    np.testing.assert_allclose(np.asarray(out), np.asarray(ref), rtol=2e-2, atol=2e-2)
    assert out.shape == (1, B, num_heads * out_dim)

    print("KERNEL_OK")
</pallas_src>

<mosaic_0001>
module attributes {stable_mosaic.version = 11 : i64} {
  func.func @mixpool_kernel(%arg0: i32, %arg1: i32, %arg2: memref<1x8x32xf32, #tpu.memory_space<vmem>>, %arg3: memref<32x128xbf16, #tpu.memory_space<vmem>>, %arg4: memref<1x128xf32, #tpu.memory_space<vmem>>, %arg5: memref<2xf32, #tpu.memory_space<smem>>, %arg6: memref<1x1x128xf32, #tpu.memory_space<vmem>>, %arg7: memref<1x128xf32, #tpu.memory_space<vmem>>, %arg8: memref<1x32xf32, #tpu.memory_space<vmem>>) attributes {dimension_semantics = [#tpu.dimension_semantics<parallel>, #tpu.dimension_semantics<arbitrary>], iteration_bounds = array<i64: 2, 1>, scalar_prefetch = 0 : i64, scratch_operands = 2 : i64, tpu.core_type = #tpu.core_type<tc>, window_params = [{transform_indices = @transform_0, window_bounds = array<i64: 1, 8, 32>}, {pipeline_mode = #tpu.pipeline_mode<synchronous>, transform_indices = @transform_1, window_bounds = array<i64: 32, 128>}, {pipeline_mode = #tpu.pipeline_mode<synchronous>, transform_indices = @transform_2, window_bounds = array<i64: 1, 128>}, {transform_indices = @transform_3, window_bounds = array<i64: 2>}, {transform_indices = @transform_4, window_bounds = array<i64: 1, 1, 128>}]} {
    %c0_i32 = arith.constant 0 : i32
    %0 = arith.cmpi eq, %arg1, %c0_i32 : i32
    %1 = arith.extui %0 : i1 to i32
    %c0_i32_0 = arith.constant 0 : i32
    %2 = arith.cmpi ne, %1, %c0_i32_0 : i32
    scf.if %2 {
      %cst_17 = arith.constant 0xFF800000 : f32
      %20 = vector.broadcast %cst_17 : f32 to vector<1x128xf32>
      %c0_18 = arith.constant 0 : index
      %c0_19 = arith.constant 0 : index
      %21 = vector.load %arg7[%c0_18, %c0_19] : memref<1x128xf32, #tpu.memory_space<vmem>>, vector<1x128xf32>
      tpu.vector_store %arg7[%c0_18, %c0_19], %20 {strides = array<i32>} : memref<1x128xf32, #tpu.memory_space<vmem>>, vector<1x128xf32>,
      %cst_20 = arith.constant 0.000000e+00 : f32
      %22 = vector.broadcast %cst_20 : f32 to vector<1x32xf32>
      %c0_21 = arith.constant 0 : index
      %c0_22 = arith.constant 0 : index
      %23 = vector.load %arg8[%c0_21, %c0_22] : memref<1x32xf32, #tpu.memory_space<vmem>>, vector<1x32xf32>
      tpu.vector_store %arg8[%c0_21, %c0_22], %22 {strides = array<i32>} : memref<1x32xf32, #tpu.memory_space<vmem>>, vector<1x32xf32>,
    } else {
    }
    %c0 = arith.constant 0 : index
    %c0_1 = arith.constant 0 : index
    %c0_2 = arith.constant 0 : index
    %3 = vector.load %arg2[%c0, %c0_1, %c0_2] : memref<1x8x32xf32, #tpu.memory_space<vmem>>, vector<1x8x32xf32>
    %4 = vector.shape_cast %3 : vector<1x8x32xf32> to vector<8x32xf32>
    %5 = arith.truncf %4 : vector<8x32xf32> to vector<8x32xbf16>
    %c0_3 = arith.constant 0 : index
    %c0_4 = arith.constant 0 : index
    %6 = vector.load %arg3[%c0_3, %c0_4] : memref<32x128xbf16, #tpu.memory_space<vmem>>, vector<32x128xbf16>
    %cst = arith.constant dense<0.000000e+00> : vector<8x128xf32>
    %7 = tpu.matmul %5, %6, %cst {dimension_numbers = #tpu.dot_dimension_numbers<[1], [0], [0], [1], [0, 0, 1, 1], [], []>} : vector<8x32xbf16>, vector<32x128xbf16>, vector<8x128xf32> -> vector<8x128xf32>
    %8 = vector.shape_cast %7 : vector<8x128xf32> to vector<1x8x128xf32>
    %c0_5 = arith.constant 0 : index
    %c0_6 = arith.constant 0 : index
    %9 = vector.load %arg7[%c0_5, %c0_6] : memref<1x128xf32, #tpu.memory_space<vmem>>, vector<1x128xf32>
    %cst_7 = arith.constant dense<0xFF800000> : vector<1x128xf32>
    %10 = vector.multi_reduction <maximumf>, %8, %cst_7 [1] : vector<1x8x128xf32> to vector<1x128xf32>
    %11 = arith.maximumf %9, %10 : vector<1x128xf32>
    %c0_8 = arith.constant 0 : index
    %c0_9 = arith.constant 0 : index
    %12 = vector.load %arg7[%c0_8, %c0_9] : memref<1x128xf32, #tpu.memory_space<vmem>>, vector<1x128xf32>
    tpu.vector_store %arg7[%c0_8, %c0_9], %11 {strides = array<i32>} : memref<1x128xf32, #tpu.memory_space<vmem>>, vector<1x128xf32>,
    %c0_10 = arith.constant 0 : index
    %c0_11 = arith.constant 0 : index
    %13 = vector.load %arg8[%c0_10, %c0_11] : memref<1x32xf32, #tpu.memory_space<vmem>>, vector<1x32xf32>
    %cst_12 = arith.constant dense<0.000000e+00> : vector<1x32xf32>
    %14 = vector.multi_reduction <add>, %3, %cst_12 [1] : vector<1x8x32xf32> to vector<1x32xf32>
    %15 = arith.addf %13, %14 : vector<1x32xf32>
    %c0_13 = arith.constant 0 : index
    %c0_14 = arith.constant 0 : index
    %16 = vector.load %arg8[%c0_13, %c0_14] : memref<1x32xf32, #tpu.memory_space<vmem>>, vector<1x32xf32>
    tpu.vector_store %arg8[%c0_13, %c0_14], %15 {strides = array<i32>} : memref<1x32xf32, #tpu.memory_space<vmem>>, vector<1x32xf32>,
    %c0_i32_15 = arith.constant 0 : i32
    %17 = arith.cmpi eq, %arg1, %c0_i32_15 : i32
    %18 = arith.extui %17 : i1 to i32
    %c0_i32_16 = arith.constant 0 : i32
    %19 = arith.cmpi ne, %18, %c0_i32_16 : i32
    scf.if %19 {
      %c0_17 = arith.constant 0 : index
      %20 = memref.load %arg5[%c0_17] : memref<2xf32, #tpu.memory_space<smem>>
      %c1 = arith.constant 1 : index
      %21 = memref.load %arg5[%c1] : memref<2xf32, #tpu.memory_space<smem>>
      %c0_18 = arith.constant 0 : index
      %c0_19 = arith.constant 0 : index
      %22 = vector.load %arg7[%c0_18, %c0_19] : memref<1x128xf32, #tpu.memory_space<vmem>>, vector<1x128xf32>
      %c0_20 = arith.constant 0 : index
      %c0_21 = arith.constant 0 : index
      %23 = vector.load %arg4[%c0_20, %c0_21] : memref<1x128xf32, #tpu.memory_space<vmem>>, vector<1x128xf32>
      %24 = arith.addf %22, %23 : vector<1x128xf32>
      %c0_22 = arith.constant 0 : index
      %c0_23 = arith.constant 0 : index
      %25 = vector.load %arg8[%c0_22, %c0_23] : memref<1x32xf32, #tpu.memory_space<vmem>>, vector<1x32xf32>
      %26 = vector.broadcast %21 : f32 to vector<1x32xf32>
      %27 = arith.mulf %26, %25 : vector<1x32xf32>
      %28 = vector.extract_strided_slice %24 {offsets = [0, 0], sizes = [1, 32], strides = [1, 1]} : vector<1x128xf32> to vector<1x32xf32>
      %29 = vector.broadcast %20 : f32 to vector<1x32xf32>
      %30 = arith.mulf %29, %28 : vector<1x32xf32>
      %31 = arith.addf %30, %27 : vector<1x32xf32>
      %c0_24 = arith.constant 0 : index
      %c0_25 = arith.constant 0 : index
      %c0_26 = arith.constant 0 : index
      %32 = vector.load %arg6[%c0_24, %c0_25, %c0_26] : memref<1x1x128xf32, #tpu.memory_space<vmem>>, vector<1x1x32xf32>
      %33 = vector.shape_cast %32 : vector<1x1x32xf32> to vector<1x32xf32>
      %34 = vector.shape_cast %31 : vector<1x32xf32> to vector<1x1x32xf32>
      tpu.vector_store %arg6[%c0_24, %c0_25, %c0_26], %34 {strides = array<i32>} : memref<1x1x128xf32, #tpu.memory_space<vmem>>, vector<1x1x32xf32>,
      %35 = vector.extract_strided_slice %24 {offsets = [0, 32], sizes = [1, 32], strides = [1, 1]} : vector<1x128xf32> to vector<1x32xf32>
      %36 = vector.broadcast %20 : f32 to vector<1x32xf32>
      %37 = arith.mulf %36, %35 : vector<1x32xf32>
      %38 = arith.addf %37, %27 : vector<1x32xf32>
      %c0_27 = arith.constant 0 : index
      %c0_28 = arith.constant 0 : index
      %c32 = arith.constant 32 : index
      %39 = vector.load %arg6[%c0_27, %c0_28, %c32] : memref<1x1x128xf32, #tpu.memory_space<vmem>>, vector<1x1x32xf32>
      %40 = vector.shape_cast %39 : vector<1x1x32xf32> to vector<1x32xf32>
      %41 = vector.shape_cast %38 : vector<1x32xf32> to vector<1x1x32xf32>
      tpu.vector_store %arg6[%c0_27, %c0_28, %c32], %41 {strides = array<i32>} : memref<1x1x128xf32, #tpu.memory_space<vmem>>, vector<1x1x32xf32>,
      %42 = vector.extract_strided_slice %24 {offsets = [0, 64], sizes = [1, 32], strides = [1, 1]} : vector<1x128xf32> to vector<1x32xf32>
      %43 = vector.broadcast %20 : f32 to vector<1x32xf32>
      %44 = arith.mulf %43, %42 : vector<1x32xf32>
      %45 = arith.addf %44, %27 : vector<1x32xf32>
      %c0_29 = arith.constant 0 : index
      %c0_30 = arith.constant 0 : index
      %c64 = arith.constant 64 : index
      %46 = vector.load %arg6[%c0_29, %c0_30, %c64] : memref<1x1x128xf32, #tpu.memory_space<vmem>>, vector<1x1x32xf32>
      %47 = vector.shape_cast %46 : vector<1x1x32xf32> to vector<1x32xf32>
      %48 = vector.shape_cast %45 : vector<1x32xf32> to vector<1x1x32xf32>
      tpu.vector_store %arg6[%c0_29, %c0_30, %c64], %48 {strides = array<i32>} : memref<1x1x128xf32, #tpu.memory_space<vmem>>, vector<1x1x32xf32>,
      %49 = vector.extract_strided_slice %24 {offsets = [0, 96], sizes = [1, 32], strides = [1, 1]} : vector<1x128xf32> to vector<1x32xf32>
      %50 = vector.broadcast %20 : f32 to vector<1x32xf32>
      %51 = arith.mulf %50, %49 : vector<1x32xf32>
      %52 = arith.addf %51, %27 : vector<1x32xf32>
      %c0_31 = arith.constant 0 : index
      %c0_32 = arith.constant 0 : index
      %c96 = arith.constant 96 : index
      %53 = vector.load %arg6[%c0_31, %c0_32, %c96] : memref<1x1x128xf32, #tpu.memory_space<vmem>>, vector<1x1x32xf32>
      %54 = vector.shape_cast %53 : vector<1x1x32xf32> to vector<1x32xf32>
      %55 = vector.shape_cast %52 : vector<1x32xf32> to vector<1x1x32xf32>
      tpu.vector_store %arg6[%c0_31, %c0_32, %c96], %55 {strides = array<i32>} : memref<1x1x128xf32, #tpu.memory_space<vmem>>, vector<1x1x32xf32>,
    } else {
    }
    return
  }
  func.func @transform_0(%arg0: i32, %arg1: i32) -> (i32, i32, i32) {
    %c0_i32 = arith.constant 0 : i32
    %c0_i32_0 = arith.constant 0 : i32
    return %arg0, %arg1, %c0_i32 : i32, i32, i32
  }
  func.func @transform_1(%arg0: i32, %arg1: i32) -> (i32, i32) {
    %c0_i32 = arith.constant 0 : i32
    %c0_i32_0 = arith.constant 0 : i32
    %c0_i32_1 = arith.constant 0 : i32
    return %c0_i32, %c0_i32_0 : i32, i32
  }
  func.func @transform_2(%arg0: i32, %arg1: i32) -> (i32, i32) {
    %c0_i32 = arith.constant 0 : i32
    %c0_i32_0 = arith.constant 0 : i32
    %c0_i32_1 = arith.constant 0 : i32
    return %c0_i32, %c0_i32_0 : i32, i32
  }
  func.func @transform_3(%arg0: i32, %arg1: i32) -> i32 {
    %c0_i32 = arith.constant 0 : i32
    %c0_i32_0 = arith.constant 0 : i32
    return %c0_i32 : i32
  }
  func.func @transform_4(%arg0: i32, %arg1: i32) -> (i32, i32, i32) {
    %c0_i32 = arith.constant 0 : i32
    %c0_i32_0 = arith.constant 0 : i32
    %c0_i32_1 = arith.constant 0 : i32
    return %arg0, %c0_i32, %c0_i32_0 : i32, i32, i32
  }
}

</mosaic_0001>

<bundles_post_ra>
// kernel: tpu_custom_call.1
= control target key start
LH: loop header
LB: loop body
LE: loop exit
PB: predicated region body
PF: predicated region fallthrough
CT: control target
= control target key end

     0   :  { %9 = vsyncpa [#allocation5], 0  ;;  %s939_s0 = inlined_call_operand.hbm [shape: f32[2,8,32], index: 0, kind: input, shape index: {}]   ;;  %s940_s1 = inlined_call_operand.hbm [shape: bf16[32,128], index: 1, kind: input, shape index: {}]   ;;  %s941_s2 = inlined_call_operand.vmem [shape: f32[1,128], index: 2, kind: input, shape index: {}]   ;;  %s942_s3 = inlined_call_operand.vmem [shape: f32[2], index: 3, kind: input, shape index: {}]   ;;  %s943_s4 = inlined_call_operand.hbm [shape: f32[2,1,128], index: 4, kind: output, shape index: {}]  }
   0x1   :  { %11 = vsyncpa [#allocation5 + $0x1], 0 }
   0x2   :  { %12 = vsyncpa [#allocation9], 0 }
   0x3   :  { %13 = vsyncpa [#allocation7], 0 }
   0x4   :  { %14 = vsyncpa [#allocation6], 0 }
   0x5   :  { %16 = vsyncpa [#allocation6 + $0x1], 0  ;;  %s784_s15 = smov 0   ;;  %s786_s16 = smov 0  }
   0x6   :  { %s788_s17 = smov 0   ;;  %s790_s18 = smov 0  }
   0x7   :  { %s792_s19 = smov 0   ;;  %s794_s20 = smov 0  }
   0x8 LB: > { %s467_s21 = sadd.s32 4294967295, %s748_s20   ;;  %p469_p0 = scmp.ge.s32.totalorder %s748_s20, 1  ;;  %s748_s20 = sphi %s794_s20, %s22_s20   ;;  %s744_s19 = sphi %s792_s19, %s953_s19   ;;  %s740_s18 = sphi %s790_s18, %s952_s18   ;;  %s736_s17 = sphi %s788_s17, %s951_s17   ;;  %s732_s16 = sphi %s786_s16, %s950_s16   ;;  %s728_s15 = sphi %s784_s15, %s949_s15  }
   0x9   : > { %p818_p1 = scmp.eq.s32.totalorder %s467_s21, 0  ;;  %p156_p2 = scmp.lt.s32.totalorder %s748_s20, 3 }
   0xa   : > { %s167_s25 = sshll.u32 %s940_s1, 4  ;;  %s750_s27 = smov [#allocation8]   ;;  %s168_s25 = int_to_ptr.hbm [resolvable:$true] %s167_s25 }
   0xb   : > { %p826_p3 = pnand %p469_p0, %p156_p2  ;;  %s169_s28 = sshll.u32 %s750_s27, 4  ;;  %s170_s28 = int_to_ptr.vmem [resolvable:$true] %s169_s28 }
   0xc   : > { %p472_p6 = scmp.ge.s32.totalorder %s748_s20, 2  ;;  %s185_s5 = sshll.u32 %s942_s3, 4  ;;  %s186_s5 = int_to_ptr.vmem [resolvable:$true] %s185_s5 }
   0xd   : > { %p505_p4 = pneg %p826_p3  ;;  %s751_s6 = smov 64  }
   0xe   : > { %s752_s7 = smov 4   ;;  %s753_s8 = smov [#allocation10]  }
   0xf   : > { %p506_p5 = pnand %p505_p4, %p818_p1  ;;  %s34_s9 = sadd.s32 1, %s744_s19 }
  0x10   : > { %s468_s10 = sadd.s32 4294967294, %s748_s20   ;;  %p36_p7 = scmp.ge.s32.totalorder %s34_s9, 2 }
  0x11   : > { %508 = dma.hbm_to_vmem [thread:$0]  (!%p506_p5), %s168_s25, 256, %s170_s28, [#allocation9], %s751_s6, %s751_s6, %s752_s7  }
  0x12   : > { %511 = dma.vmem_to_smem (!%p506_p5), %s186_s5, 16, %s753_s8, [#allocation7]  }
  0x13   : > { %s43_s11 = sadd.s32 1, %s736_s17  ;;  %p50_p8 = scmp.ne.s32.totalorder %s736_s17, %s732_s16 }
  0x14   : > { %s955_s9 = smov (%p36_p7, %s34_s9), 0  ;;  %p51_p9 = scmp.eq.s32.totalorder %s748_s20, 0 }
  0x15   : > { %p56_p10 = scmp.ne.s32.totalorder %s732_s16, %s728_s15  ;;  %s38_s12 = ssub.s32 %s744_s19, %s955_s9 }
  0x16   : > { %p143_p11 = scmp.eq.s32.totalorder %s467_s21, 1  ;;  %p41_p12 = scmp.eq.s32.totalorder %s38_s12, 0 }
  0x17   : > { %p854_p13 = por %p818_p1, %p56_p10  ;;  %p149_p2 = scmp.eq.s32.totalorder %s468_s10, 1 }
  0x18   : > { %p858_p0 = por %p143_p11, %p50_p8  ;;  %p52_p4 = por %p51_p9, %p50_p8 }
  0x19   : > { %s863_s23 = scalar_select %p41_p12, %s736_s17, %s43_s11  }
  0x1a   : > { %p865_p5 = por %p149_p2, %p56_p10  ;;  %s196_s25 = sand.u32 1, %s736_s17  }
  0x1b   : > { %s474_s21 = sshll.u32 %s744_s19, 3  ;;  %p522_p7 = scmp.lt.s32.totalorder %s748_s20, 2 }
  0x1c   : > { %s473_s27 = sshll.u32 %s196_s25, 3  ;;  %s205_s30 = scalar_lea.hbm %s939_s0, %s474_s21 }
  0x1d   : > { %s207_s5 = sshll.u32 %s205_s30, 4  ;;  %s200_s6 = scalar_lea.vmem [#allocation4], %s473_s27  ;;  %s208_s5 = int_to_ptr.hbm [resolvable:$true] %s207_s5 }
  0x1e   : > { %s209_s7 = sshll.u32 %s200_s6, 4  ;;  %p513_p11 = pnand %p522_p7, %p52_p4  ;;  %s210_s7 = int_to_ptr.vmem [resolvable:$true] %s209_s7 }
  0x1f   : > { %s197_s8 = scalar_lea.sflag [#allocation5], %s196_s25  ;;  %218 = sbr.rel (%p826_p3) target bundleno = 211 (0xd3), region = 36 }
  0x20   : > { %515 = dma.hbm_to_vmem [thread:$0]  (!%p513_p11), %s208_s5, 128, %s210_s7, %s197_s8  }
  0x21   : > { %s878_s10 = sand.u32 (!%p826_p3), 1, %s732_s16  }
  0x22   : > { %s476_s11 = sshll.u32 (!%p826_p3), %s878_s10, 3  ;;  %s221_s12 = scalar_lea.sflag (!%p826_p3), [#allocation5], %s878_s10 }
  0x23   : > { %s224_s21 = scalar_lea.vmem (!%p826_p3), [#allocation4], %s476_s11 }
  0x24   : > { %711 = dma.done.wait (%p854_p13), %s221_s12, 128  }
  0x25   : > { %713 = vsyncadd (%p854_p13), %s221_s12, 4294967168 }
  0x26   : > { %715 = dma.done.wait (%p818_p1), [#allocation9], 256  }
  0x27   : > { %717 = vsyncadd (%p818_p1), [#allocation9], 4294967040 }
  0x28   : > { %719 = dma.done.wait (%p818_p1), [#allocation7], 16  }
  0x29   : > { %721 = vsyncadd (%p818_p1), [#allocation7], 4294967280 }
  0x2a   : > { %240 = sfence }
  0x2b   : > { %v492_v0 = vld [vmem:[#allocation8 + $0x8] sm:$0xff]  ;;  %vm266_vm0 = vcmask 253952   ;;  %v268_v1 = vld [vmem:[%s224_s21] sm:$0xff]  ;;  %vm286_vm1 = vcmask 261120   ;;  %v754_v2 = vmov 0.0   ;;  %v491_v4 = vld [vmem:[#allocation8] sm:$0xff]  ;;  %s366_s6 = scalar_lea.hbm %s943_s4, %s740_s18 }
  0x2c   : > { %267 = vst.msk [vmem:[#allocation3] sm:$0x1] %vm266_vm0, %v754_v2  ;;  %v313_v3 = vsel %vm286_vm1, %v268_v1, 0.0  ;;  %296 = vmatpush.bf16.msra.mxu0 %v492_v0  ;;  %v755_v6 = vmov -inf   ;;  %v269_v8 = vpack.c.bf16 %v268_v1, %v268_v1  ;;  %s488_s22 = sld [smem:[#allocation10 + $0x1]]  ;;  %s756_s26 = smov 32  }
  0x2d   : > { %v314_v5 = vrot.slane %v313_v3, 4  ;;  %265 = vst [vmem:[#allocation2] sm:$0x1] %v755_v6  ;;  %s757_s13 = smov 96   ;;  %s758_s25 = smov 64   ;;  %vm343_vm2 = vcmask 516352  }
  0x2e   : > { %s326_s27 = sld [smem:[#allocation10]]  ;;  %v329_v29 = vld [vmem:[%s941_s2] sm:$0x1]  ;;  %s259_s7 = scalar_lea.vmem [#allocation11], %s878_s10  ;;  %vm349_vm3 = vcmask 778752   ;;  %vm355_vm4 = vcmask 1041152  }
  0x2f   : > { %v315_v7 = vadd.f32 %v314_v5, %v313_v3  ;;  %s368_s8 = sshll.u32 %s259_s7, 4  ;;  %s370_s11 = sshll.u32 %s366_s6, 4  ;;  %s369_s8 = int_to_ptr.vmem [resolvable:$true] %s368_s8  ;;  %s371_s11 = int_to_ptr.hbm [resolvable:$true] %s370_s11 }
  0x30   : > { %297 = vmatpush.bf16.msra.mxu0 %v491_v4  ;;  %s358_s18 = scalar_lea.sflag [#allocation6], %s878_s10  ;;  %s672_s12 = sshra.s32 %s371_s11, 4  ;;  %s673_s12 = int_to_ptr.hbm [resolvable:$true] %s672_s12 }
  0x31   : > { %v316_v9 = vrot.slane %v315_v7, 2  ;;  %s674_s21 = scalar_lea.hbm %s673_s12, 1  ;;  %p679_p9 = scmp.lt.s32.totalorder %s673_s12, %s943_s4 }
  0x32   : > { %v332_v15 = vstv %s488_s22  ;;  %p675_p1 = scmp.ne.s32.totalorder %s673_s12, %s674_s21 }
  0x33   : > { %v317_v10 = vadd.f32 %v316_v9, %v315_v7  ;;  %487 = vmatmul.msk.bf16.vlgmr.msra.gmra.mxu0 %vm286_vm1, %v269_v8  ;;  %v312_v12 = vld [vmem:[#allocation3] sm:$0x1] }
  0x34   : > { %v303_v25 = vld [vmem:[#allocation2] sm:$0x1]  ;;  %v334_v30 = vstv %s326_s27  ;;  %p676_p3 = pnand %p675_p1, %p858_p0 }
  0x35   : > { %v318_v11 = vrot.slane %v317_v10, 1 }
  0x36   : > { %p677_p8 = pneg %p676_p3 }
  0x37   : > { %v319_v13 = vadd.f32 %v318_v11, %v317_v10 }
  0x39   : > { %v320_v14 = vadd.f32 %v319_v13, %v312_v12 }
  0x3b   : > { %322 = vst.msk [vmem:[#allocation3] sm:$0x1] %vm266_vm0, %v320_v14 }
  0x42   : > { %v331_v16 = vld [vmem:[#allocation3] sm:$0x1] }
  0x43   : > { %v333_v17 = vmul.f32 %v332_v15, %v331_v16 }
  0x45   : > { %339 = vrot.lane.b32.xlu0 %v333_v17, %s756_s26  ;;  %351 = vrot.lane.b32.xlu1 %v333_v17, %s757_s13  ;;  %s678_s13 = scalar_lea.hbm %s943_s4, 2 }
  0x46   : > { %p680_p10 = scmp.lt.s32.totalorder %s678_s13, %s674_s21 }
  0x48   : > { %p681_p12 = por %p680_p10, %p679_p9 }
  0x4a   : > { %p682_p13 = pnand %p681_p12, %p677_p8 }
  0x4d   : > { %345 = vrot.lane.b32.xlu0 %v333_v17, %s758_s25 }
  0xb0   : > { %v299_v18 = vpop.f32.mrf.mxu0 }
  0xb1   : > { %v304_v19 = vrot.slane %v299_v18, 4 }
  0xb3   : > { %v305_v20 = vmax.f32 %v299_v18, %v304_v19 }
  0xb5   : > { %v306_v21 = vrot.slane %v305_v20, 2 }
  0xb7   : > { %v307_v22 = vmax.f32 %v305_v20, %v306_v21  ;;  %v340_v28 = vpop.permute.xlu0 %339  ;;  %v352_v37 = vpop.permute.xlu1 %351 }
  0xb8   : > { %v301_v23 = vpop.f32.mrf.mxu0 }
  0xb9   : > { %v308_v24 = vrot.slane %v307_v22, 1 }
  0xbb   : > { %v309_v26 = vmax.f32 %v307_v22, %v308_v24 }
  0xbd   : > { %v310_v27 = vmax.f32 %v303_v25, %v309_v26 }
  0xbf   : > { %311 = vst [vmem:[#allocation2] sm:$0x1] %v310_v27  ;;  %v346_v34 = vpop.permute.xlu0 %345 }
  0xc6   : > { %v328_v31 = vld [vmem:[#allocation2] sm:$0x1] }
  0xc7   : > { %v330_v32 = vadd.f32 %v329_v29, %v328_v31 }
  0xc9   : > { %v335_v33 = vmul.f32 %v334_v30, %v330_v32 }
  0xcb   : > { %v336_v35 = vadd.f32 %v335_v33, %v333_v17  ;;  %v342_v36 = vadd.f32 %v340_v28, %v335_v33  ;;  %v348_v38 = vadd.f32 %v346_v34, %v335_v33  ;;  %v354_v39 = vadd.f32 %v352_v37, %v335_v33 }
  0xcd   : > { %337 = vst.msk [vmem:[%s259_s7] sm:$0x1] %vm266_vm0, %v336_v35 }
  0xce   : > { %344 = vst.msk [vmem:[%s259_s7] sm:$0x1] %vm343_vm2, %v342_v36 }
  0xcf   : > { %350 = vst.msk [vmem:[%s259_s7] sm:$0x1] %vm349_vm3, %v348_v38 }
  0xd0   : > { %356 = vst.msk [vmem:[%s259_s7] sm:$0x1] %vm355_vm4, %v354_v39 }
  0xd1   : > { %685 = shalt.err (!%p682_p13)
}
  0xd2   : > { %503 = dma.vmem_to_hbm [thread:$0]  (%p858_p0), %s369_s8, 16, %s371_s11, %s358_s18  }
  0xd3 PF: > { %s382_s10 = sand.u32 1, %s728_s15   ;;  %p517_p2 = pnand %p472_p6, %p865_p5 }
  0xd4   : > { %s383_s28 = scalar_lea.sflag [#allocation6], %s382_s10 }
  0xd5   : > { %p518_p4 = pneg %p517_p2 }
  0xd7   : > { %723 = dma.done.wait (%p518_p4), %s383_s28, 16  }
  0xd8   : > { %725 = vsyncadd (%p518_p4), %s383_s28, 4294967280  ;;  %s22_s20 = sadd.s32 1, %s748_s20   ;;  %s949_s15 = smov %s732_s16 }
  0xd9   : > { %p19_p7 = scmp.ge.s32.totalorder %s22_s20, 4   ;;  %s950_s16 = smov %s736_s17 }
  0xda   : > { %s951_s17 = smov %s863_s23  ;;  %s952_s18 = smov %s744_s19 }
  0xdb   : > { %s953_s19 = smov %s955_s9  ;;  %21 = sbr.rel (!%p19_p7) target bundleno = 8 (0x8), region = 98 }
  0xe0   :  { %388 = vsyncpa [#allocation5], 1 }
  0xe1   :  { %390 = vsyncpa [#allocation5 + $0x1], 1 }
  0xe2   :  { %391 = vsyncpa [#allocation9], 1 }
  0xe3   :  { %392 = vsyncpa [#allocation6], 1 }
  0xe4   :  { %394 = vsyncpa [#allocation6 + $0x1], 1 }
  0xe5   :  { %395 = vsyncpa [#allocation7], 1 }
  0xe6   :  { %397 = vsyncpa [#allocation7 + $0x1], 1 }

</bundles_post_ra>
